<compile_context>
chip_gen: v6e
topology: v6e:2x2x1
jax: 0.10.0
libtpu: 0.0.40
codegen_flags: <defaults>
</compile_context>

<pallas_src>
import math
import functools

import jax
import jax.numpy as jnp
from jax.experimental import pallas as pl
from jax.experimental.pallas import tpu as pltpu


def _round_up(x: int, m: int) -> int:
    return ((x + m - 1) // m) * m


# ---------------------------------------------------------------------------
# Kernel 1: P = softmax(W, axis)  (f32 math, stored in the matmul operand dtype)
# ---------------------------------------------------------------------------
def _softmax_kernel(w_ref, p_ref, *, axis: int):
    w = w_ref[...].astype(jnp.float32)
    m = jnp.max(w, axis=axis, keepdims=True)
    e = jnp.exp(w - m)
    # exact divide (approx=False) keeps the row/column sum-to-one property tight.
    p = e * pl.reciprocal(jnp.sum(e, axis=axis, keepdims=True), approx=False)
    p_ref[...] = p.astype(p_ref.dtype)


# ---------------------------------------------------------------------------
# Kernel 2: batch-tiled matmul  out_tile = x_tile @ P   (f32 MXU accumulation)
# ---------------------------------------------------------------------------
def _matmul_kernel(x_ref, p_ref, o_ref):
    o_ref[...] = jnp.dot(
        x_ref[...], p_ref[...], preferred_element_type=jnp.float32
    ).astype(o_ref.dtype)


def stochastic_matrix_forward(x, weight, side: str = "right", block_batch: int = 256):
    """x: (..., in_features); weight: (in_features, out_features)."""
    axis = 1 if side == "right" else 0
    in_features, out_features = weight.shape
    assert x.shape[-1] == in_features

    lead = x.shape[:-1]
    x2d = x.reshape(-1, in_features)
    batch = x2d.shape[0]

    # --- 1) softmax(W) once, in its own small kernel (W fits VMEM as one block). ---
    p = pl.pallas_call(
        functools.partial(_softmax_kernel, axis=axis),
        out_shape=jax.ShapeDtypeStruct((in_features, out_features), x.dtype),
        in_specs=[pl.BlockSpec(memory_space=pltpu.MemorySpace.VMEM)],
        out_specs=pl.BlockSpec(memory_space=pltpu.MemorySpace.VMEM),
    )(weight)

    # --- 2) batch-tiled matmul with double-buffered x/out tiles and resident P. ---
    sublane = 16 if x.dtype == jnp.bfloat16 else 8
    if batch >= block_batch:
        tb = block_batch                      # 256: multiple of 8/16, fills v6e/v7x MXU
    else:
        tb = _round_up(max(batch, 1), sublane)
    padded_batch = _round_up(batch, tb)
    if padded_batch != batch:
        x2d = jnp.pad(x2d, ((0, padded_batch - batch), (0, 0)))

    grid = (padded_batch // tb,)

    # TODO(synk): for very large in_features/out_features add a K (or N) grid axis with
    # an f32 VMEM accumulator and set vmem_limit_bytes explicitly (v5e default 16 MiB,
    # v7x physical VMEM is only 64 MiB); unnecessary at these sizes.
    out2d = pl.pallas_call(
        _matmul_kernel,
        out_shape=jax.ShapeDtypeStruct((padded_batch, out_features), x.dtype),
        grid_spec=pltpu.PrefetchScalarGridSpec(
            num_scalar_prefetch=0,
            grid=grid,
            in_specs=[
                pl.BlockSpec((tb, in_features), lambda i: (i, 0)),          # streamed
                pl.BlockSpec((in_features, out_features), lambda i: (0, 0)),  # resident
            ],
            out_specs=pl.BlockSpec((tb, out_features), lambda i: (i, 0)),
        ),
        compiler_params=pltpu.CompilerParams(
            dimension_semantics=("parallel",),   # lets v7x shard batch tiles over 2 TCs
        ),
    )(x2d, p)

    if padded_batch != batch:
        out2d = out2d[:batch]
    return out2d.reshape(*lead, out_features)


def init_stochastic_matrix_weight(key, in_features, out_features, dtype=jnp.float32):
    # nn.init.kaiming_uniform_(W, a=sqrt(5)) on a (in_features, out_features) tensor:
    # fan_in = W.size(1) = out_features; gain = sqrt(2/(1+a^2)) = sqrt(1/3);
    # bound = gain * sqrt(3/fan_in) = 1/sqrt(out_features); U(-bound, bound).
    bound = 1.0 / math.sqrt(out_features)
    return jax.random.uniform(
        key, (in_features, out_features), dtype=dtype, minval=-bound, maxval=bound
    )


if __name__ == "__main__":
    key = jax.random.PRNGKey(0)
    k_x, k_w, k_x2 = jax.random.split(key, 3)

    in_features, out_features = 32, 128
    weight = init_stochastic_matrix_weight(k_w, in_features, out_features)

    # case 1: side='right', leading dims (2, 4)
    x = jax.random.normal(k_x, (2, 4, in_features), dtype=jnp.float32)
    out = stochastic_matrix_forward(x, weight, side="right")
    out = jax.block_until_ready(out)
    ref = x @ jax.nn.softmax(weight, axis=1)
    assert out.shape == (2, 4, out_features)
    assert jnp.allclose(out, ref, atol=1e-5, rtol=1e-5)

    # case 2: side='left', batch not a multiple of the tile (exercises padding path)
    x2 = jax.random.normal(k_x2, (5, in_features), dtype=jnp.float32)
    out2 = stochastic_matrix_forward(x2, weight, side="left")
    out2 = jax.block_until_ready(out2)
    ref2 = x2 @ jax.nn.softmax(weight, axis=0)
    assert out2.shape == (5, out_features)
    assert jnp.allclose(out2, ref2, atol=1e-5, rtol=1e-5)

    print("KERNEL_OK")
</pallas_src>

<mosaic_0001>
module attributes {stable_mosaic.version = 11 : i64} {
  func.func @_softmax_kernel(%arg0: memref<32x128xf32, #tpu.memory_space<vmem>>, %arg1: memref<32x128xf32, #tpu.memory_space<vmem>>) attributes {dimension_semantics = [], scalar_prefetch = 0 : i64, scratch_operands = 0 : i64, tpu.core_type = #tpu.core_type<tc>} {
    %c0 = arith.constant 0 : index
    %c0_0 = arith.constant 0 : index
    %0 = vector.load %arg0[%c0, %c0_0] : memref<32x128xf32, #tpu.memory_space<vmem>>, vector<32x128xf32>
    %cst = arith.constant dense<0xFF800000> : vector<32xf32>
    %1 = vector.multi_reduction <maximumf>, %0, %cst [1] : vector<32x128xf32> to vector<32xf32>
    %2 = vector.shape_cast %1 : vector<32xf32> to vector<32x1xf32>
    %3 = vector.broadcast %2 : vector<32x1xf32> to vector<32x128xf32>
    %4 = arith.subf %0, %3 : vector<32x128xf32>
    %5 = math.exp %4 : vector<32x128xf32>
    %cst_1 = arith.constant dense<0.000000e+00> : vector<32xf32>
    %6 = vector.multi_reduction <add>, %5, %cst_1 [1] : vector<32x128xf32> to vector<32xf32>
    %7 = vector.shape_cast %6 : vector<32xf32> to vector<32x1xf32>
    %8 = tpu.reciprocal %7 : vector<32x1xf32> -> vector<32x1xf32>
    %9 = vector.broadcast %8 : vector<32x1xf32> to vector<32x128xf32>
    %10 = arith.mulf %5, %9 : vector<32x128xf32>
    %c0_2 = arith.constant 0 : index
    %c0_3 = arith.constant 0 : index
    %11 = vector.load %arg1[%c0_2, %c0_3] : memref<32x128xf32, #tpu.memory_space<vmem>>, vector<32x128xf32>
    tpu.vector_store %arg1[%c0_2, %c0_3], %10 {strides = array<i32>} : memref<32x128xf32, #tpu.memory_space<vmem>>, vector<32x128xf32>,
    return
  }
}

</mosaic_0001>

<bundles_post_ra>
// kernel: tpu_custom_call.1
= control target key start
LH: loop header
LB: loop body
LE: loop exit
PB: predicated region body
PF: predicated region fallthrough
CT: control target
= control target key end

     0   :  { %6 = vsyncpa [#allocation3], 0  ;;  %s174_s0 = inlined_call_operand.hbm [shape: f32[32,128], index: 0, kind: input, shape index: {}]   ;;  %s175_s1 = inlined_call_operand.hbm [shape: f32[32,128], index: 1, kind: output, shape index: {}]  }
   0x1   :  { %7 = vsyncpa [#allocation4], 0  ;;  %s148_s6 = smov [#allocation2]  }
   0x2   :  { %s13_s7 = sshll.u32 %s148_s6, 4  ;;  %s14_s7 = int_to_ptr.vmem [resolvable:$true] %s13_s7 }
   0x3   :  { %s112_s8 = scalar_lea.vmem %s14_s7, 512  ;;  %p117_p1 = scmp.lt.s32.totalorder %s14_s7, %s14_s7 }
   0x4   :  { %p113_p0 = scmp.ne.s32.totalorder %s14_s7, %s112_s8  ;;  %p118_p2 = scmp.lt.s32.totalorder %s112_s8, %s112_s8 }
   0x6   :  { %p119_p3 = por %p118_p2, %p117_p1 }
   0x8   :  { %p120_p4 = pnand %p119_p3, %p113_p0 }
   0xa   :  { %123 = shalt.err (!%p120_p4)
}
   0xb   :  { %s149_s9 = smov 128   ;;  %s150_s10 = smov 8  }
   0xc   :  { %19 = dma.hbm_to_vmem [thread:$0]  %s174_s0, 512, %s14_s7, [#allocation3], %s149_s9, %s149_s9, %s150_s10  }
   0xd   :  { %144 = dma.done.wait [#allocation3], 512  }
   0xe   :  { %145 = vsyncadd [#allocation3], 4294966784  ;;  %v23_v0 = vld [vmem:[#allocation2] sm:$0xff]  ;;  %v25_v1 = vld [vmem:[#allocation2 + $0x10] sm:$0xff]  ;;  %s151_s0 = smov [#allocation5]  }
   0xf   :  { %27 = vmax.xlane.f32.xlu0 %v23_v0  ;;  %31 = vmax.xlane.f32.xlu1 %v25_v1  ;;  %v24_v2 = vld [vmem:[#allocation2 + $0x8] sm:$0xff]  ;;  %v26_v3 = vld [vmem:[#allocation2 + $0x18] sm:$0xff]  ;;  %s72_s13 = sshll.u32 %s151_s0, 4  ;;  %s73_s13 = int_to_ptr.vmem [resolvable:$true] %s72_s13 }
  0x10   :  { %s124_s14 = scalar_lea.vmem %s73_s13, 512  ;;  %p129_p6 = scmp.lt.s32.totalorder %s73_s13, %s73_s13 }
  0x11   :  { %p125_p5 = scmp.ne.s32.totalorder %s73_s13, %s124_s14  ;;  %p130_p7 = scmp.lt.s32.totalorder %s124_s14, %s124_s14 }
  0x13   :  { %29 = vmax.xlane.f32.xlu0 %v24_v2  ;;  %33 = vmax.xlane.f32.xlu1 %v26_v3  ;;  %p131_p8 = por %p130_p7, %p129_p6 }
  0x15   :  { %p132_p9 = pnand %p131_p8, %p125_p5 }
  0x98   :  { %v28_v4 = vpop.xlane.xlu0 %27  ;;  %v32_v5 = vpop.xlane.xlu1 %31 }
  0x99   :  { %v35_v6 = vsub.f32 %v23_v0, %v28_v4  ;;  %v37_v7 = vsub.f32 %v25_v1, %v32_v5 }
  0x9b   :  { %v39_v8 = vmul.f32 1.442695, %v35_v6  ;;  %v43_v9 = vmul.f32 1.442695, %v37_v7 }
  0x9c   :  { %v30_v10 = vpop.xlane.xlu0 %29  ;;  %v34_v11 = vpop.xlane.xlu1 %33 }
  0x9d   :  { %88 = vpow2.f32 %v39_v8  ;;  %v36_v12 = vsub.f32 %v24_v2, %v30_v10  ;;  %v38_v13 = vsub.f32 %v26_v3, %v34_v11 }
  0x9e   :  { %90 = vpow2.f32 %v43_v9 }
  0x9f   :  { %v41_v14 = vmul.f32 1.442695, %v36_v12  ;;  %v45_v15 = vmul.f32 1.442695, %v38_v13 }
  0xa1   :  { %92 = vpow2.f32 %v41_v14 }
  0xa2   :  { %94 = vpow2.f32 %v45_v15 }
  0xaa   :  { %v89_v16 = vpop.eup %88 }
  0xab   :  { %47 = vadd.xlane.f32.xlu0 %v89_v16  ;;  %v91_v17 = vpop.eup %90 }
  0xae   :  { %v93_v18 = vpop.eup %92 }
  0xaf   :  { %51 = vadd.xlane.f32.xlu0 %v91_v17  ;;  %49 = vadd.xlane.f32.xlu1 %v93_v18  ;;  %v95_v19 = vpop.eup %94 }
  0xb3   :  { %53 = vadd.xlane.f32.xlu1 %v95_v19 }
 0x134   :  { %v48_v20 = vpop.xlane.xlu0 %47 }
 0x135   :  { %96 = vrcp.f32 %v48_v20 }
 0x138   :  { %v50_v21 = vpop.xlane.xlu1 %49  ;;  %v52_v22 = vpop.xlane.xlu0 %51 }
 0x139   :  { %98 = vrcp.f32 %v50_v21 }
 0x13a   :  { %100 = vrcp.f32 %v52_v22 }
 0x13c   :  { %v54_v23 = vpop.xlane.xlu1 %53 }
 0x13d   :  { %102 = vrcp.f32 %v54_v23 }
 0x142   :  { %v97_v24 = vpop.eup %96 }
 0x143   :  { %v59_v25 = vmul.f32 %v97_v24, %v89_v16 }
 0x145   :  { %63 = vst [vmem:[#allocation5] sm:$0xff] %v59_v25 }
 0x146   :  { %v99_v26 = vpop.eup %98 }
 0x147   :  { %v101_v27 = vpop.eup %100  ;;  %v60_v28 = vmul.f32 %v99_v26, %v93_v18 }
 0x148   :  { %v61_v29 = vmul.f32 %v101_v27, %v91_v17 }
 0x149   :  { %64 = vst [vmem:[#allocation5 + $0x8] sm:$0xff] %v60_v28 }
 0x14a   :  { %v103_v30 = vpop.eup %102  ;;  %65 = vst [vmem:[#allocation5 + $0x10] sm:$0xff] %v61_v29 }
 0x14b   :  { %v62_v31 = vmul.f32 %v103_v30, %v95_v19 }
 0x14d   :  { %66 = vst [vmem:[#allocation5 + $0x18] sm:$0xff] %v62_v31 }
 0x14e   :  { %135 = shalt.err (!%p132_p9)
}
 0x14f   :  { %78 = dma.vmem_to_hbm [thread:$0]  %s73_s13, 512, %s175_s1, [#allocation4], %s149_s9, %s149_s9, %s150_s10  }
 0x150   :  { %146 = dma.done.wait [#allocation4], 512  }
 0x151   :  { %147 = vsyncadd [#allocation4], 4294966784 }
 0x152   :  { %82 = vsyncpa [#allocation3], 1 }
 0x153   :  { %83 = vsyncpa [#allocation4], 1 }

</bundles_post_ra>
